<compile_context>
chip_gen: v7x
topology: tpu7x:2x2x1
jax: 0.10.0
libtpu: 0.0.40
codegen_flags: <defaults>
</compile_context>

<pallas_src>
import functools

import jax
import jax.numpy as jnp
from jax.experimental import pallas as pl
from jax.experimental.pallas import tpu as pltpu

_MiB = 1024 * 1024


# --------------------------------------------------------------------------
# Activation
# --------------------------------------------------------------------------
def _apply_act(y, act: str):
    if act == "sigmoid":
        return jax.nn.sigmoid(y)
    elif act == "relu":
        return jnp.maximum(y, 0.0)
    elif act == "leaky_relu":
        # PyTorch nn.LeakyReLU default negative_slope = 0.01
        return jnp.where(y >= 0.0, y, 0.01 * y)
    elif act == "tanh":
        return jnp.tanh(y)
    else:
        raise NotImplementedError(act)


# --------------------------------------------------------------------------
# Kernels
# --------------------------------------------------------------------------
def _dense_kernel_multi_k(x_ref, w_ref, b_ref, o_ref, acc_ref, *, act: str):
    """3-D grid (i, j, k): K is a sequential reduction into a f32 scratch."""
    k = pl.program_id(2)

    @pl.when(k == 0)
    def _():
        acc_ref[...] = jnp.zeros_like(acc_ref)

    # Steady state is pure MXU work with f32 accumulation.
    acc_ref[...] += jnp.dot(
        x_ref[...], w_ref[...], preferred_element_type=jnp.float32
    )

    # Epilogue only once per output tile: bias + activation + cast + store.
    @pl.when(k == pl.num_programs(2) - 1)
    def _():
        y = acc_ref[...] + b_ref[...].astype(jnp.float32)  # [1,tn] bcast
        o_ref[...] = _apply_act(y, act).astype(o_ref.dtype)


def _dense_kernel_single_k(x_ref, w_ref, b_ref, o_ref, *, act: str):
    """2-D grid (i, j): whole K fits one tile -> no scratch, no init pass."""
    y = jnp.dot(x_ref[...], w_ref[...], preferred_element_type=jnp.float32)
    y = y + b_ref[...].astype(jnp.float32)
    o_ref[...] = _apply_act(y, act).astype(o_ref.dtype)


# --------------------------------------------------------------------------
# Tile selection helpers
# --------------------------------------------------------------------------
def _round_up(v: int, m: int) -> int:
    return (v + m - 1) // m * m


def _sublane_align(dtype) -> int:
    """Minimum second-minor tile size for a dtype (sublane packing)."""
    bits = jnp.dtype(dtype).itemsize * 8
    if bits >= 32:
        return 8
    if bits == 16:
        return 16
    return 32


def _vmem_capacity_bytes() -> int:
    try:
        info = pltpu.get_tpu_info()
        cap = getattr(info, "vmem_capacity_bytes", None)
        if cap:
            return int(cap)
    except Exception:
        pass
    return 64 * _MiB  # conservative fallback (v7x-sized)


def _prefer_core_split(vmem_cap: int) -> bool:
    """True on chips with >1 TensorCore (v7x); heuristic fallback on VMEM size."""
    try:
        info = pltpu.get_tpu_info()
        for attr in ("num_cores", "num_tensorcores", "tensorcore_count"):
            n = getattr(info, attr, None)
            if n:
                return int(n) > 1
    except Exception:
        pass
    # v7x: 64 MiB / TC;  v5e / v6e: 128 MiB single TC.
    return vmem_cap < 100 * _MiB


def _pick_tile(dim: int, align: int, cap: int) -> int:
    """Largest multiple of `align` that divides `dim` and is <= cap.

    `dim` is assumed to already be a multiple of `align`, so `align` itself is
    always a valid answer -> no padding is ever introduced by the tile choice.
    """
    cap = max(align, min(cap, dim))
    t = (cap // align) * align
    while t > align:
        if dim % t == 0:
            return t
        t -= align
    return align


def _footprint_bytes(tm: int, tk: int, tn: int, itemsize: int, ksteps: int) -> int:
    # Double-buffered pipelined x / w / b / out tiles + f32 accumulator.
    buf = 2 * itemsize * (tm * tk + tk * tn + tn + tm * tn)
    acc = 4 * tm * tn if ksteps > 1 else 0
    return buf + acc


def _select_tiles(Mp: int, Kp: int, Np: int, sub: int, itemsize: int,
                  budget: int):
    """Pick padding-free tiles under a VMEM budget.

    Shrink order when over budget: tk first (no effect on HBM reuse), then tn
    (costs x re-reads), then tm (costs w re-reads) -- never below the hardware
    minima (sub, 128, 128).
    """
    tm_cap, tn_cap, tk_cap = 512, 1024, 1024
    while True:
        tm = _pick_tile(Mp, sub, tm_cap)
        tn = _pick_tile(Np, 128, tn_cap)
        tk = _pick_tile(Kp, 128, tk_cap)
        fp = _footprint_bytes(tm, tk, tn, itemsize, Kp // tk)
        if fp <= budget:
            return tm, tk, tn
        if tk > 128:
            tk_cap = max(128, tk // 2)
        elif tn > 128:
            tn_cap = max(128, tn // 2)
        elif tm > sub:
            tm_cap = max(sub, tm // 2)
        else:
            return tm, tk, tn  # already minimal; accept


# --------------------------------------------------------------------------
# Pallas wrapper
# --------------------------------------------------------------------------
def dense_pallas(x, w, b, act: str = "relu", *, out_dtype=None):
    """x: [M, K], w: [K, N], b: [1, N] -> [M, N]  (Linear + activation)."""
    M, K = x.shape
    Kw, N = w.shape
    assert K == Kw and b.shape == (1, N)
    out_dtype = out_dtype or x.dtype

    sub = _sublane_align(x.dtype)
    itemsize = jnp.dtype(x.dtype).itemsize

    # Lane / sublane rounded problem dims (minimum legal padding only).
    Mp = _round_up(M, sub)
    Kp = _round_up(K, 128)
    Np = _round_up(N, 128)

    vmem_cap = _vmem_capacity_bytes()
    budget = min(vmem_cap // 4, 32 * _MiB)  # v5e/v6e: 32 MiB, v7x: 16 MiB
    tm, tk, tn = _select_tiles(Mp, Kp, Np, sub, itemsize, budget)

    # v7x: make sure the parallel M/N grid has >= 2 iterations so both
    # TensorCores get work.  On single-TC chips this would only add w
    # refetch traffic, so skip it there.
    if _prefer_core_split(vmem_cap) and (Mp // tm) * (Np // tn) == 1:
        tm2 = _pick_tile(Mp, sub, max(sub, Mp // 2))
        if Mp // tm2 >= 2:
            tm = tm2

    ksteps = Kp // tk
    footprint = _footprint_bytes(tm, tk, tn, itemsize, ksteps)
    vmem_limit = max(32 * _MiB, min((vmem_cap * 3) // 4, footprint + 16 * _MiB))

    # Pad only when the raw dims are not already lane/sublane aligned.
    xp = x if (Mp, Kp) == (M, K) else jnp.pad(x, ((0, Mp - M), (0, Kp - K)))
    wp = w if (Kp, Np) == (K, N) else jnp.pad(w, ((0, Kp - K), (0, Np - N)))
    bp = b if Np == N else jnp.pad(b, ((0, 0), (0, Np - N)))

    transcendentals = Mp * Np if act in ("tanh", "sigmoid") else 0
    cost = pl.CostEstimate(
        flops=2 * Mp * Kp * Np,
        transcendentals=transcendentals,
        bytes_accessed=itemsize * (Mp * Kp + Kp * Np + Np)
        + jnp.dtype(out_dtype).itemsize * Mp * Np,
    )

    if ksteps == 1:
        grid = (Mp // tm, Np // tn)
        out = pl.pallas_call(
            functools.partial(_dense_kernel_single_k, act=act),
            out_shape=jax.ShapeDtypeStruct((Mp, Np), out_dtype),
            grid_spec=pltpu.PrefetchScalarGridSpec(
                num_scalar_prefetch=0,
                grid=grid,
                in_specs=[
                    pl.BlockSpec((tm, Kp), lambda i, j: (i, 0)),
                    pl.BlockSpec((Kp, tn), lambda i, j: (0, j)),
                    pl.BlockSpec((1, tn), lambda i, j: (0, j)),
                ],
                out_specs=pl.BlockSpec((tm, tn), lambda i, j: (i, j)),
            ),
            compiler_params=pltpu.CompilerParams(
                dimension_semantics=("parallel", "parallel"),
                vmem_limit_bytes=vmem_limit,
            ),
            cost_estimate=cost,
        )(xp, wp, bp)
    else:
        grid = (Mp // tm, Np // tn, ksteps)
        out = pl.pallas_call(
            functools.partial(_dense_kernel_multi_k, act=act),
            out_shape=jax.ShapeDtypeStruct((Mp, Np), out_dtype),
            grid_spec=pltpu.PrefetchScalarGridSpec(
                num_scalar_prefetch=0,
                grid=grid,
                in_specs=[
                    pl.BlockSpec((tm, tk), lambda i, j, k: (i, k)),
                    pl.BlockSpec((tk, tn), lambda i, j, k: (k, j)),
                    pl.BlockSpec((1, tn), lambda i, j, k: (0, j)),
                ],
                out_specs=pl.BlockSpec((tm, tn), lambda i, j, k: (i, j)),
                scratch_shapes=[pltpu.VMEM((tm, tn), jnp.float32)],
            ),
            compiler_params=pltpu.CompilerParams(
                dimension_semantics=("parallel", "parallel", "arbitrary"),
                vmem_limit_bytes=vmem_limit,
            ),
            cost_estimate=cost,
        )(xp, wp, bp)

    if (Mp, Np) != (M, N):
        out = out[:M, :N]
    return out


def dense(x, w, b, act: str = "relu", *, force_pallas: bool = False,
          compute_dtype=None):
    """Dense = Linear(x @ w + b) followed by activation.

    x may have arbitrary leading dims (flattened to [M, K]).  For tiny
    problems the Pallas launch overhead dwarfs the FLOPs, so fall back to
    XLA's fused matmul unless forced.  Set `compute_dtype=jnp.bfloat16` to
    run the MXU at its native bf16 rate (f32 accumulation is kept inside the
    kernel; output is cast back to x's dtype).
    """
    orig_dtype = x.dtype
    lead = x.shape[:-1]
    K = x.shape[-1]
    N = w.shape[1]
    x2 = x.reshape(-1, K)
    b2 = b.reshape(1, N)
    M = x2.shape[0]

    if not force_pallas and (M * K * N) < (128 * 128 * 128):
        y = jnp.dot(x2, w, preferred_element_type=jnp.float32) + b2.astype(jnp.float32)
        out = _apply_act(y, act).astype(orig_dtype)
    else:
        if compute_dtype is not None:
            x2 = x2.astype(compute_dtype)
            w = w.astype(compute_dtype)
        out = dense_pallas(x2, w, b2, act, out_dtype=orig_dtype)
    return out.reshape(*lead, N)


def _reference(x, w, b, act):
    y = jnp.dot(x, w, preferred_element_type=jnp.float32) + b.astype(jnp.float32)
    return _apply_act(y, act).astype(x.dtype)


if __name__ == "__main__":
    key = jax.random.PRNGKey(0)

    # --- 1) Small shape consistent with the module: batch=8, in=32, hidden=32.
    batch, input_dim, hidden_dim = 8, 32, 32
    act = "relu"
    kx, kw, kb, key = jax.random.split(key, 4)
    bound = 1.0 / (input_dim ** 0.5)
    x = jax.random.normal(kx, (batch, input_dim), dtype=jnp.float32)
    w = jax.random.uniform(kw, (input_dim, hidden_dim), dtype=jnp.float32,
                           minval=-bound, maxval=bound)
    b = jax.random.uniform(kb, (1, hidden_dim), dtype=jnp.float32,
                           minval=-bound, maxval=bound)

    out = dense(x, w, b, act=act, force_pallas=True)  # force the Pallas path
    out = jax.block_until_ready(out)
    ref = _reference(x, w, b, act)
    assert out.shape == (batch, hidden_dim)
    assert jnp.allclose(out, ref, atol=1e-5, rtol=1e-5), "small-shape mismatch"

    # --- 2) Larger ragged-N shape: now tiles (tm<=512, tn=640, tk=1024) divide
    #        the dims exactly -> zero padding, zero wrapper-side HBM passes.
    M2, K2, N2 = 512, 1024, 640
    kx, kw, kb, key = jax.random.split(key, 4)
    bound2 = 1.0 / (K2 ** 0.5)
    x2 = jax.random.normal(kx, (M2, K2), dtype=jnp.float32)
    w2 = jax.random.uniform(kw, (K2, N2), dtype=jnp.float32,
                            minval=-bound2, maxval=bound2)
    b2 = jax.random.uniform(kb, (1, N2), dtype=jnp.float32,
                            minval=-bound2, maxval=bound2)

    out2 = dense(x2, w2, b2, act="tanh")
    out2 = jax.block_until_ready(out2)
    ref2 = _reference(x2, w2, b2, "tanh")
    assert out2.shape == (M2, N2)
    assert jnp.allclose(out2, ref2, atol=1e-4, rtol=1e-4), "tiled-shape mismatch"

    # --- 3) Multi-K-step accumulation path (K split across grid axis 2).
    M3, K3, N3 = 256, 2048, 384
    kx, kw, kb, key = jax.random.split(key, 4)
    bound3 = 1.0 / (K3 ** 0.5)
    x3 = jax.random.normal(kx, (M3, K3), dtype=jnp.float32)
    w3 = jax.random.uniform(kw, (K3, N3), dtype=jnp.float32,
                            minval=-bound3, maxval=bound3)
    b3 = jax.random.uniform(kb, (1, N3), dtype=jnp.float32,
                            minval=-bound3, maxval=bound3)
    out3 = dense_pallas(x3, w3, b3, act="sigmoid")  # direct Pallas path
    out3 = jax.block_until_ready(out3)
    ref3 = _reference(x3, w3, b3, "sigmoid")
    assert jnp.allclose(out3, ref3, atol=1e-5, rtol=1e-5), "multi-K mismatch"

    print("KERNEL_OK")
</pallas_src>

<mosaic_0001>
module attributes {stable_mosaic.version = 11 : i64} {
  func.func @_dense_kernel_single_k(%arg0: i32, %arg1: i32, %arg2: memref<8x128xf32, #tpu.memory_space<vmem>>, %arg3: memref<128x128xf32, #tpu.memory_space<vmem>>, %arg4: memref<1x128xf32, #tpu.memory_space<vmem>>, %arg5: memref<8x128xf32, #tpu.memory_space<vmem>>) attributes {dimension_semantics = [#tpu.dimension_semantics<parallel>, #tpu.dimension_semantics<parallel>], iteration_bounds = array<i64: 1, 1>, scalar_prefetch = 0 : i64, scratch_operands = 0 : i64, tpu.core_type = #tpu.core_type<tc>, window_params = [{transform_indices = @transform_0, window_bounds = array<i64: 8, 128>}, {transform_indices = @transform_1, window_bounds = array<i64: 128, 128>}, {transform_indices = @transform_2, window_bounds = array<i64: 1, 128>}, {transform_indices = @transform_3, window_bounds = array<i64: 8, 128>}]} {
    %c0 = arith.constant 0 : index
    %c0_0 = arith.constant 0 : index
    %0 = vector.load %arg2[%c0, %c0_0] : memref<8x128xf32, #tpu.memory_space<vmem>>, vector<8x128xf32>
    %c0_1 = arith.constant 0 : index
    %c0_2 = arith.constant 0 : index
    %1 = vector.load %arg3[%c0_1, %c0_2] : memref<128x128xf32, #tpu.memory_space<vmem>>, vector<128x128xf32>
    %cst = arith.constant dense<0.000000e+00> : vector<8x128xf32>
    %2 = tpu.matmul %0, %1, %cst {dimension_numbers = #tpu.dot_dimension_numbers<[1], [0], [0], [1], [0, 0, 1, 1], [], []>} : vector<8x128xf32>, vector<128x128xf32>, vector<8x128xf32> -> vector<8x128xf32>
    %c0_3 = arith.constant 0 : index
    %c0_4 = arith.constant 0 : index
    %3 = vector.load %arg4[%c0_3, %c0_4] : memref<1x128xf32, #tpu.memory_space<vmem>>, vector<1x128xf32>
    %4 = vector.broadcast %3 : vector<1x128xf32> to vector<8x128xf32>
    %5 = arith.addf %2, %4 : vector<8x128xf32>
    %cst_5 = arith.constant 0.000000e+00 : f32
    %6 = vector.broadcast %cst_5 : f32 to vector<8x128xf32>
    %7 = arith.maximumf %5, %6 : vector<8x128xf32>
    %c0_6 = arith.constant 0 : index
    %c0_7 = arith.constant 0 : index
    %8 = vector.load %arg5[%c0_6, %c0_7] : memref<8x128xf32, #tpu.memory_space<vmem>>, vector<8x128xf32>
    tpu.vector_store %arg5[%c0_6, %c0_7], %7 {strides = array<i32>} : memref<8x128xf32, #tpu.memory_space<vmem>>, vector<8x128xf32>,
    return
  }
  func.func @transform_0(%arg0: i32, %arg1: i32) -> (i32, i32) {
    %c0_i32 = arith.constant 0 : i32
    %c0_i32_0 = arith.constant 0 : i32
    return %arg0, %c0_i32 : i32, i32
  }
  func.func @transform_1(%arg0: i32, %arg1: i32) -> (i32, i32) {
    %c0_i32 = arith.constant 0 : i32
    %c0_i32_0 = arith.constant 0 : i32
    return %c0_i32, %arg1 : i32, i32
  }
  func.func @transform_2(%arg0: i32, %arg1: i32) -> (i32, i32) {
    %c0_i32 = arith.constant 0 : i32
    %c0_i32_0 = arith.constant 0 : i32
    return %c0_i32, %arg1 : i32, i32
  }
  func.func @transform_3(%arg0: i32, %arg1: i32) -> (i32, i32) {
    %c0_i32 = arith.constant 0 : i32
    return %arg0, %arg1 : i32, i32
  }
}

</mosaic_0001>

<bundles_post_ra>
// kernel: tpu_custom_call.1
= control target key start
LH: loop header
LB: loop body
LE: loop exit
PB: predicated region body
PF: predicated region fallthrough
CT: control target
= control target key end

     0   :  { %8 = vsyncpa [#allocation3], 0  ;;  %s384_s0 = inlined_call_operand.hbm [shape: f32[8,128], index: 0, kind: input, shape index: {}]   ;;  %s385_s1 = inlined_call_operand.hbm [shape: f32[128,128], index: 1, kind: input, shape index: {}]   ;;  %s386_s2 = inlined_call_operand.vmem [shape: f32[1,128], index: 2, kind: input, shape index: {}]   ;;  %s387_s3 = inlined_call_operand.hbm [shape: f32[8,128], index: 3, kind: output, shape index: {}]  }
   0x1   :  { %9 = vsyncpa [#allocation6], 0 }
   0x2   :  { %10 = vsyncpa [#allocation4], 0  ;;  %s310_s12 = smov [#allocation2]   ;;  %s311_s14 = smov [#allocation5]  }
   0x3   :  { %s17_s13 = sshll.u32 %s310_s12, 4  ;;  %s26_s15 = sshll.u32 %s311_s14, 4  ;;  %s18_s13 = int_to_ptr.vmem [resolvable:$true] %s17_s13  ;;  %s338_s15 = int_to_ptr.vmem [resolvable:$true] %s26_s15 }
   0x4   :  { %s238_s18 = scalar_lea.hbm %s384_s0, 128 }
   0x5   :  { %p239_p0 = scmp.ne.s32.totalorder %s384_s0, %s238_s18  ;;  %p242_p1 = scmp.lt.u32.totalorder %s238_s18, %s384_s0 }
   0x7   :  { %p244_p2 = pnand %p242_p1, %p239_p0 }
   0x9   :  { %247 = shalt.err (!%p244_p2)
}
   0xa   :  { %s248_s23 = scalar_lea.vmem %s18_s13, 128  ;;  %p253_p4 = scmp.lt.s32.totalorder %s18_s13, %s18_s13 }
   0xb   :  { %p249_p3 = scmp.ne.s32.totalorder %s18_s13, %s248_s23  ;;  %p254_p5 = scmp.lt.s32.totalorder %s248_s23, %s248_s23 }
   0xd   :  { %p255_p6 = por %p254_p5, %p253_p4 }
   0xf   :  { %p256_p7 = pnand %p255_p6, %p249_p3 }
  0x11   :  { %259 = shalt.err (!%p256_p7)
}
  0x12   :  { %20 = dma.hbm_to_vmem [thread:$0]  %s384_s0, 128, %s18_s13, [#allocation3]  }
  0x13   :  { %s260_s28 = scalar_lea.hbm %s385_s1, 2048 }
  0x14   :  { %p261_p8 = scmp.ne.s32.totalorder %s385_s1, %s260_s28  ;;  %p264_p9 = scmp.lt.u32.totalorder %s260_s28, %s385_s1 }
  0x16   :  { %p266_p10 = pnand %p264_p9, %p261_p8 }
  0x18   :  { %269 = shalt.err (!%p266_p10)
}
  0x19   :  { %s270_s6 = scalar_lea.vmem %s338_s15, 2048  ;;  %p275_p12 = scmp.lt.s32.totalorder %s338_s15, %s338_s15 }
  0x1a   :  { %p271_p11 = scmp.ne.s32.totalorder %s338_s15, %s270_s6  ;;  %p276_p13 = scmp.lt.s32.totalorder %s270_s6, %s270_s6 }
  0x1c   :  { %p277_p0 = por %p276_p13, %p275_p12 }
  0x1e   :  { %p278_p1 = pnand %p277_p0, %p271_p11 }
  0x20   :  { %281 = shalt.err (!%p278_p1)
}
  0x21   :  { %s312_s0 = smov 128   ;;  %s313_s7 = smov 8  }
  0x22   :  { %32 = dma.hbm_to_vmem [thread:$0]  %s385_s1, 2048, %s338_s15, [#allocation6], %s312_s0, %s312_s0, %s313_s7  }
  0x23   :  { %304 = dma.done.wait [#allocation3], 128  }
  0x24   :  { %305 = vsyncadd [#allocation3], 4294967168 }
  0x25   :  { %306 = dma.done.wait [#allocation6], 2048  }
  0x26   :  { %307 = vsyncadd [#allocation6], 4294965248  ;;  %v314_v0 = vmov 0.0|0.0   ;;  %vm315_vm0 = vmmov 0   ;;  %v316_v1 = vmov 0.0   ;;  %v42_v2 = vld [vmem:[#allocation5] sm:$0xff] }
  0x27   :  { %206 = vmatprep.subr.bf16.mxu0 %v314_v0  ;;  %203 = vmatprep.mubr.msk.f32.mxu0 %vm315_vm0, %v316_v1  ;;  %v43_v3 = vld [vmem:[#allocation5 + $0x8] sm:$0xff]  ;;  %v44_v4 = vld [vmem:[#allocation5 + $0x10] sm:$0xff]  ;;  %v45_v6 = vld [vmem:[#allocation5 + $0x18] sm:$0xff]  ;;  %s317_s11 = smov [#allocation7]  }
  0x28   :  { %v207_v5 = vpack.c.bf16 %v43_v3, %v42_v2  ;;  %v210_v7 = vpack.c.bf16 %v45_v6, %v44_v4  ;;  %v46_v8 = vld [vmem:[#allocation5 + $0x20] sm:$0xff]  ;;  %v47_v9 = vld [vmem:[#allocation5 + $0x28] sm:$0xff]  ;;  %v48_v11 = vld [vmem:[#allocation5 + $0x30] sm:$0xff]  ;;  %s143_s12 = sshll.u32 %s317_s11, 4  ;;  %s144_s12 = int_to_ptr.vmem [resolvable:$true] %s143_s12 }
  0x29   :  { %v213_v10 = vpack.c.bf16 %v47_v9, %v46_v8  ;;  %v49_v12 = vld [vmem:[#allocation5 + $0x38] sm:$0xff]  ;;  %v50_v14 = vld [vmem:[#allocation5 + $0x40] sm:$0xff]  ;;  %v51_v15 = vld [vmem:[#allocation5 + $0x48] sm:$0xff]  ;;  %s282_s13 = scalar_lea.vmem %s144_s12, 128  ;;  %p287_p3 = scmp.lt.s32.totalorder %s144_s12, %s144_s12 }
  0x2a   :  { %208 = vmatpush3.bf16.msra.mxu0 %v207_v5  ;;  %v216_v13 = vpack.c.bf16 %v49_v12, %v48_v11  ;;  %v219_v16 = vpack.c.bf16 %v51_v15, %v50_v14  ;;  %v52_v17 = vld [vmem:[#allocation5 + $0x50] sm:$0xff]  ;;  %v53_v18 = vld [vmem:[#allocation5 + $0x58] sm:$0xff]  ;;  %v54_v20 = vld [vmem:[#allocation5 + $0x60] sm:$0xff]  ;;  %p283_p2 = scmp.ne.s32.totalorder %s144_s12, %s282_s13  ;;  %p288_p4 = scmp.lt.s32.totalorder %s282_s13, %s282_s13 }
  0x2b   :  { %209 = vmatprep.subr.bf16.mxu0 %v314_v0  ;;  %v222_v19 = vpack.c.bf16 %v53_v18, %v52_v17  ;;  %v55_v21 = vld [vmem:[#allocation5 + $0x68] sm:$0xff]  ;;  %v56_v23 = vld [vmem:[#allocation5 + $0x70] sm:$0xff]  ;;  %v57_v24 = vld [vmem:[#allocation5 + $0x78] sm:$0xff] }
  0x2c   :  { %v225_v22 = vpack.c.bf16 %v55_v21, %v54_v20  ;;  %v228_v25 = vpack.c.bf16 %v57_v24, %v56_v23  ;;  %v41_v26 = vld [vmem:[#allocation2] sm:$0xff]  ;;  %p289_p5 = por %p288_p4, %p287_p3 }
  0x2d   :  { %v153_v27 = vld [vmem:[%s386_s2] ss:$0 sm:$0xff] }
  0x2e   :  { %211 = vmatpush3.bf16.msra.mxu0 %v210_v7  ;;  %p290_p6 = pnand %p289_p5, %p283_p2 }
  0x2f   :  { %212 = vmatprep.subr.bf16.mxu0 %v314_v0 }
  0x32   :  { %214 = vmatpush3.bf16.msra.mxu0 %v213_v10 }
  0x33   :  { %215 = vmatprep.subr.bf16.mxu0 %v314_v0 }
  0x36   :  { %217 = vmatpush3.bf16.msra.mxu0 %v216_v13 }
  0x37   :  { %218 = vmatprep.subr.bf16.mxu0 %v314_v0 }
  0x3a   :  { %220 = vmatpush3.bf16.msra.mxu0 %v219_v16 }
  0x3b   :  { %221 = vmatprep.subr.bf16.mxu0 %v314_v0 }
  0x3e   :  { %223 = vmatpush3.bf16.msra.mxu0 %v222_v19 }
  0x3f   :  { %224 = vmatprep.subr.bf16.mxu0 %v314_v0 }
  0x42   :  { %226 = vmatpush3.bf16.msra.mxu0 %v225_v22 }
  0x43   :  { %227 = vmatprep.subr.bf16.mxu0 %v314_v0 }
  0x46   :  { %229 = vmatpush3.bf16.msra.mxu0 %v228_v25 }
  0x49   :  { %204 = vmatmul.mubr.f32.vlgmr.msra.gmra.mrb[0].mxu0 %v41_v26 }
 0x11c   :  { %v131_v28 = vpop.f32.mrb[0].mxu0 }
 0x11d   :  { %v132_v29 = vadd.f32 %v153_v27, %v131_v28  ;;  %v205_v30 = vpop.f32.mrb[1].mxu0 }
 0x11f   :  { %v135_v31 = vmax.f32 %v132_v29, 0.0 }
 0x121   :  { %136 = vst [vmem:[#allocation7] sm:$0xff] %v135_v31 }
 0x122   :  { %293 = shalt.err (!%p290_p6)
}
 0x123   :  { %s294_s16 = scalar_lea.hbm %s387_s3, 128 }
 0x124   :  { %p295_p7 = scmp.ne.s32.totalorder %s387_s3, %s294_s16  ;;  %p298_p8 = scmp.lt.u32.totalorder %s294_s16, %s387_s3 }
 0x126   :  { %p300_p9 = pnand %p298_p8, %p295_p7 }
 0x128   :  { %303 = shalt.err (!%p300_p9)
}
 0x129   :  { %146 = dma.vmem_to_hbm [thread:$0]  %s144_s12, 128, %s387_s3, [#allocation4]  }
 0x12a   :  { %308 = dma.done.wait [#allocation4], 128  }
 0x12b   :  { %309 = vsyncadd [#allocation4], 4294967168 }
 0x12c   :  { %150 = vsyncpa [#allocation3], 1 }
 0x12d   :  { %151 = vsyncpa [#allocation6], 1 }
 0x12e   :  { %152 = vsyncpa [#allocation4], 1 }

</bundles_post_ra>
